<compile_context>
chip_gen: v6e
topology: v6e:2x2x1
jax: 0.10.0
libtpu: 0.0.40
codegen_flags: <defaults>
</compile_context>

<pallas_src>
import math

import jax
import jax.numpy as jnp
import numpy as np
from jax.experimental import pallas as pl
from jax.experimental.pallas import tpu as pltpu

_MIB = 1024 * 1024


# ---------------------------------------------------------------------------
# Chip-aware tuning helpers
# ---------------------------------------------------------------------------
def _tpu_hw_params():
    """Returns (physical VMEM bytes per TensorCore, TensorCores per chip)."""
    vmem_phys = 128 * _MIB
    num_cores = 1
    kind = ""
    try:
        dev = jax.devices()[0]
        kind = (getattr(dev, "device_kind", "") or "").lower()
        num_cores = max(1, int(getattr(dev, "num_cores", 1) or 1))
    except Exception:
        pass
    try:
        info = pltpu.get_tpu_info()
        vmem_phys = int(getattr(info, "vmem_capacity_bytes", vmem_phys))
    except Exception:
        pass
    if "v7" in kind or "7x" in kind:      # v7x: 2 TensorCores, 64 MiB VMEM / TC
        num_cores = max(num_cores, 2)
        vmem_phys = min(vmem_phys, 64 * _MIB)
    return vmem_phys, num_cores


def _choose_tb(bh, per_unit_bytes, *, vmem_budget, num_cores):
    """How many (batch, head) problems to process per grid step."""
    tb = max(1, min(bh, vmem_budget // max(per_unit_bytes, 1)))
    # Only keep >= num_cores grid steps when the chip actually has more than
    # one TensorCore (v7x); on v5e/v6e the grid is a serial loop and bigger
    # blocks / fewer steps are strictly better for a mem-bound kernel.
    if num_cores > 1 and bh >= num_cores:
        tb = min(tb, max(1, (bh + num_cores - 1) // num_cores))
    return tb


# ---------------------------------------------------------------------------
# Kernel body
# ---------------------------------------------------------------------------
def _make_kernel(scale, with_attn):
    """Refs are (TB, M, Lsd) / (TB, N, Lsd) blocks (TB = batch*head slice)."""

    def kernel(q_ref, k_ref, v_ref, o_ref, *maybe_a_ref):
        q = q_ref[...]                          # (TB, M, Lsd)
        k = k_ref[...]                          # (TB, N, Lsd)
        v = v_ref[...]                          # (TB, N, Lsd)

        # scores[t, m, n] = sum_c Q[t, m, c] * K[t, n, c]   (batched over t)
        s = jax.lax.dot_general(
            q, k, (((2,), (2,)), ((0,), (0,))),
            preferred_element_type=jnp.float32) * scale    # (TB, M, N)

        # softmax over the last axis
        s_max = jnp.max(s, axis=-1, keepdims=True)
        p = jnp.exp(s - s_max)
        row_sum = jnp.sum(p, axis=-1, keepdims=True)
        # EUP approximate reciprocal + one Newton step (rel. err ~1e-7).
        inv = pl.reciprocal(row_sum, approx=True)
        inv = inv * (2.0 - row_sum * inv)
        a = p * inv                                        # (TB, M, N)

        # out[t, m, c] = sum_n A[t, m, n] * V[t, n, c]
        o = jax.lax.dot_general(
            a.astype(v.dtype), v, (((2,), (1,)), ((0,), (0,))),
            preferred_element_type=jnp.float32)            # (TB, M, Lsd)

        o_ref[...] = o.astype(o_ref.dtype)
        if with_attn:
            a_ref = maybe_a_ref[0]
            a_ref[...] = a.astype(a_ref.dtype)

    return kernel


# ---------------------------------------------------------------------------
# Wrapper matching SegmentCorrelation2.forward
# ---------------------------------------------------------------------------
def segment_correlation2(queries, keys, values, attn_mask=None, *,
                         factor=1, scale=None, head_flag=True,
                         output_attention=False):
    """Matches SegmentCorrelation2.forward (dropout is defined but never applied
    in the reference forward, so it is omitted)."""
    del attn_mask  # unused by the reference forward
    B, L_q, H, D_q = queries.shape
    _, L_k, _, D_k = keys.shape
    _, L_v, _, D_v = values.shape
    L_s = factor
    scale_val = scale if scale is not None else 1.0 / math.sqrt(L_s * D_q)
    assert L_k == L_v
    assert D_q == D_k == D_v
    assert L_s <= L_q and L_s <= L_v

    add_q = L_q % L_s
    add_v = L_v % L_s
    if head_flag:
        queries = queries[:, add_q:]
        keys = keys[:, add_v:]
        values = values[:, add_v:]
        # NOTE: reference code takes addition_Q from the *already sliced* queries.
        addition_Q = queries[:, :add_q] if add_q != 0 else None
    else:
        queries = queries[:, :-add_q] if add_q != 0 else queries
        keys = keys[:, :-add_v] if add_v != 0 else keys
        values = values[:, :-add_v] if add_v != 0 else values
        addition_Q = queries[:, -add_q:] if add_q != 0 else None

    M = queries.shape[1] // L_s
    N = keys.shape[1] // L_s
    Lsd = L_s * D_q
    BH = B * H
    dtype = queries.dtype
    itemsize = jnp.dtype(dtype).itemsize

    # --- relayout (B, nseg*L_s, H, D) -> (B*H, nseg, L_s*D) ------------------
    # TODO(synk): DMA-ing directly from the (B, L, H, D) layout would need a
    # head-dim block of size 1 in the second-minor position (violates the
    # (8,128) block rule), so the transpose stays in XLA and is exposed to the
    # pallas_call via allow_input_fusion instead.
    def to_bh(x, nseg):
        return (x.reshape(B, nseg, L_s, H, D_q)
                 .transpose(0, 3, 1, 2, 4)
                 .reshape(BH, nseg, Lsd))

    q_bh = to_bh(queries, M)
    k_bh = to_bh(keys, N)
    v_bh = to_bh(values, N)

    # --- chip-aware block sizing ---------------------------------------------
    vmem_phys, num_cores = _tpu_hw_params()
    vmem_limit = max(min(int(0.75 * vmem_phys), vmem_phys - 8 * _MIB), 16 * _MIB)
    vmem_budget = int(0.7 * vmem_limit)        # headroom for compiler scratch

    # Per-(batch*head) VMEM bytes: double-buffered streamed blocks (q, k, v, o)
    # plus f32 intermediates (scores / exp / probs, f32 accumulator, cast copy).
    per_unit = (2 * M * Lsd + 2 * 2 * N * Lsd + 2 * M * Lsd) * itemsize
    per_unit += (3 * M * N + 2 * M * Lsd) * 4
    if output_attention:
        per_unit += 2 * M * N * 4              # A block, double-buffered

    TB = _choose_tb(BH, per_unit, vmem_budget=vmem_budget, num_cores=num_cores)
    grid = (pl.cdiv(BH, TB),)                  # ragged last block padded by Pallas

    kernel = _make_kernel(scale_val, output_attention)

    in_specs = [pl.BlockSpec((TB, M, Lsd), lambda i: (i, 0, 0)),
                pl.BlockSpec((TB, N, Lsd), lambda i: (i, 0, 0)),
                pl.BlockSpec((TB, N, Lsd), lambda i: (i, 0, 0))]

    flops = 4 * BH * M * N * Lsd               # two matmuls, 2 flops per MAC
    transcendentals = BH * M * N               # exp
    bytes_accessed = itemsize * BH * (2 * M * Lsd + 2 * N * Lsd)
    if output_attention:
        bytes_accessed += 4 * BH * M * N
        out_shape = (jax.ShapeDtypeStruct((BH, M, Lsd), dtype),
                     jax.ShapeDtypeStruct((BH, M, N), jnp.float32))
        out_specs = (pl.BlockSpec((TB, M, Lsd), lambda i: (i, 0, 0)),
                     pl.BlockSpec((TB, M, N), lambda i: (i, 0, 0)))
    else:
        out_shape = jax.ShapeDtypeStruct((BH, M, Lsd), dtype)
        out_specs = pl.BlockSpec((TB, M, Lsd), lambda i: (i, 0, 0))

    result = pl.pallas_call(
        kernel,
        out_shape=out_shape,
        grid=grid,
        in_specs=in_specs,
        out_specs=out_specs,
        compiler_params=pltpu.CompilerParams(
            dimension_semantics=("parallel",),
            vmem_limit_bytes=int(vmem_limit),
            allow_input_fusion=[True, True, True]),
        cost_estimate=pl.CostEstimate(
            flops=flops,
            transcendentals=transcendentals,
            bytes_accessed=bytes_accessed),
    )(q_bh, k_bh, v_bh)

    if output_attention:
        o_bh, a_bh = result
    else:
        o_bh, a_bh = result, None

    # (B*H, M, L_s*D) -> (B, M*L_s, H, D)
    V = (o_bh.reshape(B, H, M, L_s, D_v)
             .transpose(0, 2, 3, 1, 4)
             .reshape(B, M * L_s, H, D_v))

    if head_flag:
        if addition_Q is not None:
            V = jnp.concatenate([addition_Q, V], axis=1)
    elif addition_Q is not None:
        V = jnp.concatenate([V, addition_Q], axis=1)

    if output_attention:
        A = a_bh.reshape(B, H, M, N)
        return V, A
    return V, None


# ---------------------------------------------------------------------------
# Pure-jnp reference mirroring the PyTorch forward
# ---------------------------------------------------------------------------
def _reference(queries, keys, values, *, factor, scale=None, head_flag=True):
    B, L_q, H, D_q = queries.shape
    L_v = values.shape[1]
    D_v = values.shape[3]
    L_s = factor
    scl = scale if scale is not None else 1.0 / math.sqrt(L_s * D_q)
    add_q = L_q % L_s
    add_v = L_v % L_s
    if head_flag:
        queries = queries[:, add_q:]
        keys = keys[:, add_v:]
        values = values[:, add_v:]
        addition_Q = queries[:, :add_q] if add_q != 0 else None
    else:
        queries = queries[:, :-add_q] if add_q != 0 else queries
        keys = keys[:, :-add_v] if add_v != 0 else keys
        values = values[:, :-add_v] if add_v != 0 else values
        addition_Q = queries[:, -add_q:] if add_q != 0 else None
    sq = queries.reshape(B, -1, L_s, H, D_q)
    sk = keys.reshape(B, -1, L_s, H, D_q)
    sv = values.reshape(B, -1, L_s, H, D_v)
    scores = jnp.einsum('bmlhd,bnlhd->bhmn', sq, sk)
    A = jax.nn.softmax(scl * scores, axis=-1)
    V = jnp.einsum('bhmn,bnlhd->bmlhd', A, sv).reshape(B, -1, H, D_v)
    if head_flag:
        if addition_Q is not None:
            V = jnp.concatenate([addition_Q, V], axis=1)
    elif addition_Q is not None:
        V = jnp.concatenate([V, addition_Q], axis=1)
    return V, A


if __name__ == "__main__":
    key = jax.random.PRNGKey(0)
    kq, kk, kv = jax.random.split(key, 3)

    # Small shapes consistent with the module: (B, L, H, D), factor = segment len.
    B, L, H, D = 2, 10, 4, 16
    factor = 4  # L % factor == 2 -> exercises the addition_Q path as well

    queries = jax.random.normal(kq, (B, L, H, D), dtype=jnp.float32)
    keys = jax.random.normal(kk, (B, L, H, D), dtype=jnp.float32)
    values = jax.random.normal(kv, (B, L, H, D), dtype=jnp.float32)

    # Variant 1: head_flag=True, with attention output.
    V_ref, A_ref = _reference(queries, keys, values, factor=factor, head_flag=True)
    V, A = segment_correlation2(queries, keys, values, None, factor=factor,
                                head_flag=True, output_attention=True)
    V = jax.block_until_ready(V)
    A = jax.block_until_ready(A)
    np.testing.assert_allclose(np.asarray(V), np.asarray(V_ref),
                               rtol=1e-5, atol=1e-5)
    np.testing.assert_allclose(np.asarray(A), np.asarray(A_ref),
                               rtol=1e-5, atol=1e-5)

    # Variant 2: head_flag=True, no attention output (no A writeback).
    V2, A2 = segment_correlation2(queries, keys, values, None, factor=factor,
                                  head_flag=True, output_attention=False)
    V2 = jax.block_until_ready(V2)
    assert A2 is None
    np.testing.assert_allclose(np.asarray(V2), np.asarray(V_ref),
                               rtol=1e-5, atol=1e-5)

    # Variant 3: head_flag=False path (addition_Q taken from truncated queries).
    V_ref_f, _ = _reference(queries, keys, values, factor=factor, head_flag=False)
    V3, A3 = segment_correlation2(queries, keys, values, None, factor=factor,
                                  head_flag=False, output_attention=False)
    V3 = jax.block_until_ready(V3)
    assert A3 is None
    np.testing.assert_allclose(np.asarray(V3), np.asarray(V_ref_f),
                               rtol=1e-5, atol=1e-5)

    print("KERNEL_OK")
</pallas_src>

<mosaic_0001>
module attributes {stable_mosaic.version = 11 : i64} {
  func.func @kernel(%arg0: i32, %arg1: memref<8x2x64xf32, #tpu.memory_space<vmem>>, %arg2: memref<8x2x64xf32, #tpu.memory_space<vmem>>, %arg3: memref<8x2x64xf32, #tpu.memory_space<vmem>>, %arg4: memref<8x2x64xf32, #tpu.memory_space<vmem>>, %arg5: memref<8x2x2xf32, #tpu.memory_space<vmem>>) attributes {dimension_semantics = [#tpu.dimension_semantics<parallel>], iteration_bounds = array<i64: 1>, scalar_prefetch = 0 : i64, scratch_operands = 0 : i64, tpu.core_type = #tpu.core_type<tc>, window_params = [{transform_indices = @transform_0, window_bounds = array<i64: 8, 2, 64>}, {transform_indices = @transform_1, window_bounds = array<i64: 8, 2, 64>}, {transform_indices = @transform_2, window_bounds = array<i64: 8, 2, 64>}, {transform_indices = @transform_3, window_bounds = array<i64: 8, 2, 64>}, {transform_indices = @transform_4, window_bounds = array<i64: 8, 2, 2>}]} {
    %c0 = arith.constant 0 : index
    %c0_0 = arith.constant 0 : index
    %c0_1 = arith.constant 0 : index
    %0 = vector.load %arg1[%c0, %c0_0, %c0_1] : memref<8x2x64xf32, #tpu.memory_space<vmem>>, vector<8x2x64xf32>
    %c0_2 = arith.constant 0 : index
    %c0_3 = arith.constant 0 : index
    %c0_4 = arith.constant 0 : index
    %1 = vector.load %arg2[%c0_2, %c0_3, %c0_4] : memref<8x2x64xf32, #tpu.memory_space<vmem>>, vector<8x2x64xf32>
    %c0_5 = arith.constant 0 : index
    %c0_6 = arith.constant 0 : index
    %c0_7 = arith.constant 0 : index
    %2 = vector.load %arg3[%c0_5, %c0_6, %c0_7] : memref<8x2x64xf32, #tpu.memory_space<vmem>>, vector<8x2x64xf32>
    %cst = arith.constant dense<0.000000e+00> : vector<8x2x2xf32>
    %3 = tpu.matmul %0, %1, %cst {dimension_numbers = #tpu.dot_dimension_numbers<[2], [2], [1], [1], [0, 0, 0, 1, 1, 1], [0], [0]>} : vector<8x2x64xf32>, vector<8x2x64xf32>, vector<8x2x2xf32> -> vector<8x2x2xf32>
    %cst_8 = arith.constant 1.250000e-01 : f32
    %4 = vector.broadcast %cst_8 : f32 to vector<8x2x2xf32>
    %5 = arith.mulf %3, %4 : vector<8x2x2xf32>
    %cst_9 = arith.constant dense<0xFF800000> : vector<8x2xf32>
    %6 = vector.multi_reduction <maximumf>, %5, %cst_9 [2] : vector<8x2x2xf32> to vector<8x2xf32>
    %7 = vector.shape_cast %6 : vector<8x2xf32> to vector<8x2x1xf32>
    %8 = vector.broadcast %7 : vector<8x2x1xf32> to vector<8x2x2xf32>
    %9 = arith.subf %5, %8 : vector<8x2x2xf32>
    %10 = math.exp %9 : vector<8x2x2xf32>
    %cst_10 = arith.constant dense<0.000000e+00> : vector<8x2xf32>
    %11 = vector.multi_reduction <add>, %10, %cst_10 [2] : vector<8x2x2xf32> to vector<8x2xf32>
    %12 = vector.shape_cast %11 : vector<8x2xf32> to vector<8x2x1xf32>
    %13 = tpu.reciprocal %12 {approx = true} : vector<8x2x1xf32> -> vector<8x2x1xf32>
    %14 = arith.mulf %12, %13 : vector<8x2x1xf32>
    %cst_11 = arith.constant 2.000000e+00 : f32
    %15 = vector.broadcast %cst_11 : f32 to vector<8x2x1xf32>
    %16 = arith.subf %15, %14 : vector<8x2x1xf32>
    %17 = arith.mulf %13, %16 : vector<8x2x1xf32>
    %18 = vector.broadcast %17 : vector<8x2x1xf32> to vector<8x2x2xf32>
    %19 = arith.mulf %10, %18 : vector<8x2x2xf32>
    %cst_12 = arith.constant dense<0.000000e+00> : vector<8x2x64xf32>
    %20 = tpu.matmul %19, %2, %cst_12 {dimension_numbers = #tpu.dot_dimension_numbers<[2], [1], [1], [2], [0, 0, 0, 1, 1, 2], [0], [0]>} : vector<8x2x2xf32>, vector<8x2x64xf32>, vector<8x2x64xf32> -> vector<8x2x64xf32>
    %c0_13 = arith.constant 0 : index
    %c0_14 = arith.constant 0 : index
    %c0_15 = arith.constant 0 : index
    %21 = vector.load %arg4[%c0_13, %c0_14, %c0_15] : memref<8x2x64xf32, #tpu.memory_space<vmem>>, vector<8x2x64xf32>
    tpu.vector_store %arg4[%c0_13, %c0_14, %c0_15], %20 {strides = array<i32>} : memref<8x2x64xf32, #tpu.memory_space<vmem>>, vector<8x2x64xf32>,
    %c0_16 = arith.constant 0 : index
    %c0_17 = arith.constant 0 : index
    %c0_18 = arith.constant 0 : index
    %22 = vector.load %arg5[%c0_16, %c0_17, %c0_18] : memref<8x2x2xf32, #tpu.memory_space<vmem>>, vector<8x2x2xf32>
    tpu.vector_store %arg5[%c0_16, %c0_17, %c0_18], %19 {strides = array<i32>} : memref<8x2x2xf32, #tpu.memory_space<vmem>>, vector<8x2x2xf32>,
    return
  }
  func.func @transform_0(%arg0: i32) -> (i32, i32, i32) {
    %c0_i32 = arith.constant 0 : i32
    %c0_i32_0 = arith.constant 0 : i32
    %c0_i32_1 = arith.constant 0 : i32
    return %arg0, %c0_i32, %c0_i32_0 : i32, i32, i32
  }
  func.func @transform_1(%arg0: i32) -> (i32, i32, i32) {
    %c0_i32 = arith.constant 0 : i32
    %c0_i32_0 = arith.constant 0 : i32
    %c0_i32_1 = arith.constant 0 : i32
    return %arg0, %c0_i32, %c0_i32_0 : i32, i32, i32
  }
  func.func @transform_2(%arg0: i32) -> (i32, i32, i32) {
    %c0_i32 = arith.constant 0 : i32
    %c0_i32_0 = arith.constant 0 : i32
    %c0_i32_1 = arith.constant 0 : i32
    return %arg0, %c0_i32, %c0_i32_0 : i32, i32, i32
  }
  func.func @transform_3(%arg0: i32) -> (i32, i32, i32) {
    %c0_i32 = arith.constant 0 : i32
    %c0_i32_0 = arith.constant 0 : i32
    %c0_i32_1 = arith.constant 0 : i32
    return %arg0, %c0_i32, %c0_i32_0 : i32, i32, i32
  }
  func.func @transform_4(%arg0: i32) -> (i32, i32, i32) {
    %c0_i32 = arith.constant 0 : i32
    %c0_i32_0 = arith.constant 0 : i32
    %c0_i32_1 = arith.constant 0 : i32
    return %arg0, %c0_i32, %c0_i32_0 : i32, i32, i32
  }
}

</mosaic_0001>

<bundles_post_ra>
// kernel: tpu_custom_call.1
= control target key start
LH: loop header
LB: loop body
LE: loop exit
PB: predicated region body
PF: predicated region fallthrough
CT: control target
= control target key end

     0   :  { %10 = vsyncpa [#allocation3], 0  ;;  %s1952_s0 = inlined_call_operand.hbm [shape: f32[8,2,64], index: 0, kind: input, shape index: {}]   ;;  %s1953_s1 = inlined_call_operand.hbm [shape: f32[8,2,64], index: 1, kind: input, shape index: {}]   ;;  %s1954_s2 = inlined_call_operand.hbm [shape: f32[8,2,64], index: 2, kind: input, shape index: {}]   ;;  %s1955_s3 = inlined_call_operand.hbm [shape: f32[8,2,64], index: 3, kind: output, shape index: {0}]   ;;  %s1956_s4 = inlined_call_operand.vmem [shape: f32[8,2,2], index: 4, kind: output, shape index: {1}]  }
   0x1   :  { %11 = vsyncpa [#allocation6], 0 }
   0x2   :  { %12 = vsyncpa [#allocation4], 0  ;;  %s1731_s15 = smov [#allocation5]   ;;  %s1732_s17 = smov [#allocation2]  }
   0x3   :  { %s30_s16 = sshll.u32 %s1731_s15, 4  ;;  %s18_s18 = sshll.u32 %s1732_s17, 4  ;;  %s31_s16 = int_to_ptr.vmem [resolvable:$true] %s30_s16  ;;  %s19_s18 = int_to_ptr.vmem [resolvable:$true] %s18_s18 }
   0x4   :  { %s1653_s19 = scalar_lea.vmem %s31_s16, 256  ;;  %p1658_p1 = scmp.lt.s32.totalorder %s31_s16, %s31_s16 }
   0x5   :  { %p1654_p0 = scmp.ne.s32.totalorder %s31_s16, %s1653_s19  ;;  %p1659_p2 = scmp.lt.s32.totalorder %s1653_s19, %s1653_s19 }
   0x7   :  { %p1660_p3 = por %p1659_p2, %p1658_p1 }
   0x9   :  { %p1661_p4 = pnand %p1660_p3, %p1654_p0 }
   0xb   :  { %1664 = shalt.err (!%p1661_p4)
}
   0xc   :  { %s1733_s20 = smov 32   ;;  %s1734_s21 = smov 2  }
   0xd   :  { %36 = dma.hbm_to_vmem [thread:$0]  %s1953_s1, 256, %s31_s16, [#allocation6], %s1733_s20, %s1733_s20, %s1734_s21  }
   0xe   :  { %s1673_s24 = scalar_lea.vmem %s19_s18, 256  ;;  %p1678_p6 = scmp.lt.s32.totalorder %s19_s18, %s19_s18 }
   0xf   :  { %p1674_p5 = scmp.ne.s32.totalorder %s19_s18, %s1673_s24  ;;  %p1679_p7 = scmp.lt.s32.totalorder %s1673_s24, %s1673_s24 }
  0x11   :  { %p1680_p8 = por %p1679_p7, %p1678_p6 }
  0x13   :  { %p1681_p9 = pnand %p1680_p8, %p1674_p5 }
  0x15   :  { %1684 = shalt.err (!%p1681_p9)
}
  0x16   :  { %24 = dma.hbm_to_vmem [thread:$0]  %s1952_s0, 256, %s19_s18, [#allocation3], %s1733_s20, %s1733_s20, %s1734_s21  }
  0x17   :  { %s1735_s27 = smov [#allocation7]  }
  0x18   :  { %s42_s28 = sshll.u32 %s1735_s27, 4  ;;  %s43_s28 = int_to_ptr.vmem [resolvable:$true] %s42_s28 }
  0x19   :  { %s1693_s29 = scalar_lea.vmem %s43_s28, 256  ;;  %p1698_p11 = scmp.lt.s32.totalorder %s43_s28, %s43_s28 }
  0x1a   :  { %p1694_p10 = scmp.ne.s32.totalorder %s43_s28, %s1693_s29  ;;  %p1699_p12 = scmp.lt.s32.totalorder %s1693_s29, %s1693_s29 }
  0x1c   :  { %p1700_p13 = por %p1699_p12, %p1698_p11 }
  0x1e   :  { %p1701_p0 = pnand %p1700_p13, %p1694_p10 }
  0x20   :  { %1704 = shalt.err (!%p1701_p0)
}
  0x21   :  { %48 = dma.hbm_to_vmem [thread:$0]  %s1954_s2, 256, %s43_s28, [#allocation6], %s1733_s20, %s1733_s20, %s1734_s21  }
  0x22   :  { %1725 = dma.done.wait [#allocation3], 256  }
  0x23   :  { %1726 = vsyncadd [#allocation3], 4294967040 }
  0x24   :  { %1727 = dma.done.wait [#allocation6], 512  }
  0x25   :  { %1728 = vsyncadd [#allocation6], 4294966784  ;;  %v1736_v0 = vmov 0.0   ;;  %vm1737_vm0 = vmmov 0   ;;  %vm82_vm1 = vcmask 523264   ;;  %vm699_vm2 = vcmask 9216  }
  0x26   :  { %1525 = vmatprep.subr.mxu0 %v1736_v0  ;;  %1527 = vmatprep.mubr.msk.f32.mxu0 %vm1737_vm0, %v1736_v0  ;;  %v66_v1 = vld [vmem:[#allocation5] sm:$0x3]  ;;  %v67_v2 = vld [vmem:[#allocation5 + $0x2] sm:$0x3]  ;;  %v58_v3 = vld [vmem:[#allocation2] sm:$0x3] }
  0x27   :  { %1530 = vmatprep.subr.mxu1 %v1736_v0  ;;  %1532 = vmatprep.mubr.msk.f32.mxu1 %vm1737_vm0, %v1736_v0  ;;  %v59_v4 = vld [vmem:[#allocation2 + $0x2] sm:$0x3]  ;;  %v68_v5 = vld [vmem:[#allocation5 + $0x4] sm:$0x3]  ;;  %v69_v6 = vld [vmem:[#allocation5 + $0x6] sm:$0x3] }
  0x28   :  { %1526 = vmatpush3.xpose.msk.msra.mxu0 %vm82_vm1, %v66_v1  ;;  %1531 = vmatpush3.xpose.msk.msra.mxu1 %vm82_vm1, %v67_v2  ;;  %v60_v7 = vld [vmem:[#allocation2 + $0x4] sm:$0x3]  ;;  %v70_v8 = vld [vmem:[#allocation5 + $0x8] sm:$0x3]  ;;  %v61_v9 = vld [vmem:[#allocation2 + $0x6] sm:$0x3] }
  0x29   :  { %1535 = vmatprep.subr.mxu0 %v1736_v0  ;;  %1540 = vmatprep.subr.mxu1 %v1736_v0  ;;  %v71_v10 = vld [vmem:[#allocation5 + $0xa] sm:$0x3]  ;;  %v62_v11 = vld [vmem:[#allocation2 + $0x8] sm:$0x3]  ;;  %v72_v12 = vld [vmem:[#allocation5 + $0xc] sm:$0x3] }
  0x2a   :  { %v63_v13 = vld [vmem:[#allocation2 + $0xa] sm:$0x3]  ;;  %v73_v14 = vld [vmem:[#allocation5 + $0xe] sm:$0x3]  ;;  %v64_v15 = vld [vmem:[#allocation2 + $0xc] sm:$0x3] }
  0x2b   :  { %1528 = vmatmul.mubr.msk.f32.vlgmr.msra.gmra.mxu0 %vm82_vm1, %v58_v3  ;;  %1533 = vmatmul.mubr.msk.f32.vlgmr.msra.gmra.mxu1 %vm82_vm1, %v59_v4  ;;  %v65_v16 = vld [vmem:[#allocation2 + $0xe] sm:$0x3]  ;;  %vm816_vm3 = vcmask 1041408   ;;  %vm812_vm4 = vcmask 15360   ;;  %vm1422_vm5 = vcmask 517120  }
  0x2c   :  { %1536 = vmatpush3.xpose.msk.msra.mxu0 %vm82_vm1, %v68_v5  ;;  %1537 = vmatprep.mubr.msk.f32.mxu0 %vm1737_vm0, %v1736_v0 }
  0x2d   :  { %1541 = vmatpush3.xpose.msk.msra.mxu1 %vm82_vm1, %v69_v6  ;;  %1545 = vmatprep.subr.mxu0 %v1736_v0 }
  0x2e   :  { %1542 = vmatprep.mubr.msk.f32.mxu1 %vm1737_vm0, %v1736_v0  ;;  %1550 = vmatprep.subr.mxu1 %v1736_v0 }
  0x2f   :  { %1538 = vmatmul.mubr.msk.f32.vlgmr.msra.gmra.mxu0 %vm82_vm1, %v60_v7 }
  0x30   :  { %1546 = vmatpush3.xpose.msk.msra.mxu0 %vm82_vm1, %v70_v8  ;;  %1543 = vmatmul.mubr.msk.f32.vlgmr.msra.gmra.mxu1 %vm82_vm1, %v61_v9 }
  0x31   :  { %1547 = vmatprep.mubr.msk.f32.mxu0 %vm1737_vm0, %v1736_v0  ;;  %1551 = vmatpush3.xpose.msk.msra.mxu1 %vm82_vm1, %v71_v10 }
  0x32   :  { %1555 = vmatprep.subr.mxu0 %v1736_v0  ;;  %1552 = vmatprep.mubr.msk.f32.mxu1 %vm1737_vm0, %v1736_v0 }
  0x33   :  { %1548 = vmatmul.mubr.msk.f32.vlgmr.msra.gmra.mxu0 %vm82_vm1, %v62_v11  ;;  %1560 = vmatprep.subr.mxu1 %v1736_v0 }
  0x34   :  { %1556 = vmatpush3.xpose.msk.msra.mxu0 %vm82_vm1, %v72_v12  ;;  %1553 = vmatmul.mubr.msk.f32.vlgmr.msra.gmra.mxu1 %vm82_vm1, %v63_v13 }
  0x35   :  { %1557 = vmatprep.mubr.msk.f32.mxu0 %vm1737_vm0, %v1736_v0  ;;  %1561 = vmatpush3.xpose.msk.msra.mxu1 %vm82_vm1, %v73_v14 }
  0x36   :  { %1562 = vmatprep.mubr.msk.f32.mxu1 %vm1737_vm0, %v1736_v0  ;;  %1565 = vmatprep.subr.mxu0 %v1736_v0 }
  0x37   :  { %1558 = vmatmul.mubr.msk.f32.vlgmr.msra.gmra.mxu0 %vm82_vm1, %v64_v15  ;;  %1570 = vmatprep.subr.mxu1 %v1736_v0 }
  0x38   :  { %1563 = vmatmul.mubr.msk.f32.vlgmr.msra.gmra.mxu1 %vm82_vm1, %v65_v16  ;;  %1567 = vmatprep.mubr.msk.f32.mxu0 %vm1737_vm0, %v1736_v0 }
  0x39   :  { %1572 = vmatprep.mubr.msk.f32.mxu1 %vm1737_vm0, %v1736_v0 }
  0xeb   :  { %v155_v17 = vpop.f32.mrf.mxu0  ;;  %v231_v18 = vpop.f32.mrf.mxu1 }
  0xec   :  { %v691_v19 = vmul.f32 0.125, %v155_v17  ;;  %v692_v20 = vmul.f32 0.125, %v231_v18 }
  0xed   :  { %v1529_v21 = vpop.f32.mrf.mxu0  ;;  %v1534_v22 = vpop.f32.mrf.mxu1 }
  0xee   :  { %v700_v23 = vsel %vm699_vm2, %v691_v19, -inf  ;;  %v703_v27 = vsel %vm699_vm2, %v692_v20, -inf }
  0xef   :  { %701 = vmax.xlane.f32.xlu0 %v700_v23  ;;  %v307_v24 = vpop.f32.mrf.mxu0 }
  0xf0   :  { %v693_v25 = vmul.f32 0.125, %v307_v24  ;;  %v383_v26 = vpop.f32.mrf.mxu1 }
  0xf1   :  { %v1539_v28 = vpop.f32.mrf.mxu0  ;;  %v694_v29 = vmul.f32 0.125, %v383_v26  ;;  %v74_v26 = vld [vmem:[#allocation7] sm:$0x3] }
  0xf2   :  { %v706_v30 = vsel %vm699_vm2, %v693_v25, -inf  ;;  %v1544_v31 = vpop.f32.mrf.mxu1  ;;  %1566 = vmatpush3.msk.msra.mxu0 %vm816_vm3, %v74_v26 }
  0xf3   :  { %704 = vmax.xlane.f32.xlu0 %v703_v27  ;;  %707 = vmax.xlane.f32.xlu1 %v706_v30  ;;  %v459_v32 = vpop.f32.mrf.mxu0  ;;  %v709_v35 = vsel %vm699_vm2, %v694_v29, -inf  ;;  %v75_v27 = vld [vmem:[#allocation7 + $0x2] sm:$0x3] }
  0xf4   :  { %v695_v33 = vmul.f32 0.125, %v459_v32  ;;  %v535_v34 = vpop.f32.mrf.mxu1  ;;  %1575 = vmatprep.subr.mxu0 %v1736_v0  ;;  %1571 = vmatpush3.msk.msra.mxu1 %vm816_vm3, %v75_v27 }
  0xf5   :  { %v1549_v36 = vpop.f32.mrf.mxu0  ;;  %v696_v37 = vmul.f32 0.125, %v535_v34  ;;  %1580 = vmatprep.subr.mxu1 %v1736_v0 }
  0xf6   :  { %v712_v38 = vsel %vm699_vm2, %v695_v33, -inf  ;;  %v1554_v39 = vpop.f32.mrf.mxu1 }
  0xf7   :  { %710 = vmax.xlane.f32.xlu1 %v709_v35  ;;  %713 = vmax.xlane.f32.xlu0 %v712_v38  ;;  %v611_v40 = vpop.f32.mrf.mxu0  ;;  %v715_v43 = vsel %vm699_vm2, %v696_v37, -inf }
  0xf8   :  { %v697_v41 = vmul.f32 0.125, %v611_v40  ;;  %v687_v42 = vpop.f32.mrf.mxu1 }
  0xf9   :  { %v698_v44 = vmul.f32 0.125, %v687_v42  ;;  %v1559_v45 = vpop.f32.mrf.mxu0 }
  0xfa   :  { %v718_v46 = vsel %vm699_vm2, %v697_v41, -inf  ;;  %v1564_v47 = vpop.f32.mrf.mxu1 }
  0xfb   :  { %716 = vmax.xlane.f32.xlu1 %v715_v43  ;;  %719 = vmax.xlane.f32.xlu0 %v718_v46  ;;  %v721_v48 = vsel %vm699_vm2, %v698_v44, -inf  ;;  %v76_v46 = vld [vmem:[#allocation7 + $0x4] sm:$0x3] }
  0xff   :  { %722 = vmax.xlane.f32.xlu1 %v721_v48 }
 0x178   :  { %v702_v49 = vpop.xlane.xlu0 %701 }
 0x179   :  { %v724_v50 = vsub.f32 %v691_v19, %v702_v49 }
 0x17b   :  { %v732_v51 = vmul.f32 1.442695, %v724_v50 }
 0x17c   :  { %v705_v52 = vpop.xlane.xlu0 %704  ;;  %v708_v53 = vpop.xlane.xlu1 %707 }
 0x17d   :  { %1613 = vpow2.f32 %v732_v51  ;;  %v725_v54 = vsub.f32 %v692_v20, %v705_v52  ;;  %v726_v55 = vsub.f32 %v693_v25, %v708_v53 }
 0x17f   :  { %v734_v56 = vmul.f32 1.442695, %v725_v54  ;;  %v736_v57 = vmul.f32 1.442695, %v726_v55 }
 0x180   :  { %v711_v58 = vpop.xlane.xlu1 %710  ;;  %v714_v59 = vpop.xlane.xlu0 %713 }
 0x181   :  { %1615 = vpow2.f32 %v734_v56  ;;  %v727_v60 = vsub.f32 %v694_v29, %v711_v58  ;;  %v728_v61 = vsub.f32 %v695_v33, %v714_v59  ;;  %v77_v56 = vld [vmem:[#allocation7 + $0x6] sm:$0x3] }
 0x182   :  { %1617 = vpow2.f32 %v736_v57 }
 0x183   :  { %v738_v62 = vmul.f32 1.442695, %v727_v60  ;;  %v740_v63 = vmul.f32 1.442695, %v728_v61  ;;  %v78_v60 = vld [vmem:[#allocation7 + $0x8] sm:$0x3] }
 0x184   :  { %v717_v1 = vpop.xlane.xlu1 %716  ;;  %v720_v2 = vpop.xlane.xlu0 %719 }
 0x185   :  { %1619 = vpow2.f32 %v738_v62  ;;  %v729_v3 = vsub.f32 %v696_v37, %v717_v1  ;;  %v730_v4 = vsub.f32 %v697_v41, %v720_v2 }
 0x186   :  { %1621 = vpow2.f32 %v740_v63 }
 0x187   :  { %v742_v5 = vmul.f32 1.442695, %v729_v3  ;;  %v744_v6 = vmul.f32 1.442695, %v730_v4 }
 0x188   :  { %v723_v7 = vpop.xlane.xlu1 %722 }
 0x189   :  { %1623 = vpow2.f32 %v742_v5  ;;  %v731_v8 = vsub.f32 %v698_v44, %v723_v7  ;;  %v79_v5 = vld [vmem:[#allocation7 + $0xa] sm:$0x3] }
 0x18a   :  { %v1614_v9 = vpop.eup %1613  ;;  %1625 = vpow2.f32 %v744_v6 }
 0x18b   :  { %v746_v10 = vmul.f32 1.442695, %v731_v8  ;;  %v748_v11 = vsel %vm699_vm2, %v1614_v9, 0.0 }
 0x18c   :  { %749 = vadd.xlane.f32.xlu0 %v748_v11 }
 0x18d   :  { %1627 = vpow2.f32 %v746_v10 }
 0x18e   :  { %v1837_v12 = vpop.eup %1615 }
 0x18f   :  { %v1839_v13 = vpop.eup %1617  ;;  %v751_v14 = vsel %vm699_vm2, %v1837_v12, 0.0 }
 0x190   :  { %752 = vadd.xlane.f32.xlu1 %v751_v14  ;;  %v754_v15 = vsel %vm699_vm2, %v1839_v13, 0.0 }
 0x191   :  { %755 = vadd.xlane.f32.xlu0 %v754_v15  ;;  %v81_v15 = vld [vmem:[#allocation7 + $0xe] sm:$0x3] }
 0x192   :  { %v1845_v16 = vpop.eup %1619 }
 0x193   :  { %v1847_v17 = vpop.eup %1621  ;;  %v757_v18 = vsel %vm699_vm2, %v1845_v16, 0.0 }
 0x194   :  { %758 = vadd.xlane.f32.xlu1 %v757_v18  ;;  %v760_v19 = vsel %vm699_vm2, %v1847_v17, 0.0 }
 0x195   :  { %761 = vadd.xlane.f32.xlu0 %v760_v19 }
 0x196   :  { %v1853_v20 = vpop.eup %1623 }
 0x197   :  { %v1855_v21 = vpop.eup %1625  ;;  %v763_v22 = vsel %vm699_vm2, %v1853_v20, 0.0 }
 0x198   :  { %764 = vadd.xlane.f32.xlu1 %v763_v22  ;;  %v766_v23 = vsel %vm699_vm2, %v1855_v21, 0.0 }
 0x199   :  { %767 = vadd.xlane.f32.xlu0 %v766_v23 }
 0x19a   :  { %v1861_v24 = vpop.eup %1627 }
 0x19b   :  { %v769_v25 = vsel %vm699_vm2, %v1861_v24, 0.0 }
 0x19c   :  { %770 = vadd.xlane.f32.xlu1 %v769_v25 }
 0x215   :  { %v750_v28 = vpop.xlane.xlu0 %749 }
 0x216   :  { %1629 = vrcp.f32 %v750_v28 }
 0x219   :  { %v753_v29 = vpop.xlane.xlu1 %752 }
 0x21a   :  { %1631 = vrcp.f32 %v753_v29  ;;  %v756_v30 = vpop.xlane.xlu0 %755 }
 0x21b   :  { %1633 = vrcp.f32 %v756_v30 }
 0x21d   :  { %v759_v31 = vpop.xlane.xlu1 %758 }
 0x21e   :  { %1635 = vrcp.f32 %v759_v31  ;;  %v762_v32 = vpop.xlane.xlu0 %761 }
 0x21f   :  { %1637 = vrcp.f32 %v762_v32 }
 0x221   :  { %v765_v33 = vpop.xlane.xlu1 %764 }
 0x222   :  { %1639 = vrcp.f32 %v765_v33  ;;  %v768_v34 = vpop.xlane.xlu0 %767 }
 0x223   :  { %v1630_v35 = vpop.eup %1629  ;;  %1641 = vrcp.f32 %v768_v34 }
 0x224   :  { %v780_v36 = vmul.f32 %v1630_v35, %v750_v28 }
 0x225   :  { %v771_v37 = vpop.xlane.xlu1 %770 }
 0x226   :  { %v788_v38 = vsub.f32 2.0, %v780_v36  ;;  %1643 = vrcp.f32 %v771_v37 }
 0x227   :  { %v1632_v39 = vpop.eup %1631 }
 0x228   :  { %v1634_v40 = vpop.eup %1633  ;;  %v796_v41 = vmul.f32 %v1630_v35, %v788_v38  ;;  %v781_v42 = vmul.f32 %v1632_v39, %v753_v29 }
 0x229   :  { %v782_v43 = vmul.f32 %v1634_v40, %v756_v30 }
 0x22a   :  { %v804_v44 = vmul.f32 %v1614_v9, %v796_v41  ;;  %v789_v45 = vsub.f32 2.0, %v781_v42  ;;  %v80_v9 = vld [vmem:[#allocation7 + $0xc] sm:$0x3] }
 0x22b   :  { %v1636_v47 = vpop.eup %1635  ;;  %v790_v48 = vsub.f32 2.0, %v782_v43 }
 0x22c   :  { %v1638_v49 = vpop.eup %1637  ;;  %1431 = vst.msk [vmem:[%s1956_s4] sm:$0x3] %vm699_vm2, %v804_v44  ;;  %v797_v50 = vmul.f32 %v1632_v39, %v789_v45  ;;  %v783_v51 = vmul.f32 %v1636_v47, %v759_v31  ;;  %1568 = vmatmul.mubr.msk.f32.vlgmr.msra.gmra.mxu0 %vm812_vm4, %v804_v44 }
 0x22d   :  { %v798_v52 = vmul.f32 %v1634_v40, %v790_v48  ;;  %v784_v53 = vmul.f32 %v1638_v49, %v762_v32  ;;  %1576 = vmatpush3.msk.msra.mxu0 %vm816_vm3, %v76_v46  ;;  %1577 = vmatprep.mubr.msk.f32.mxu0 %vm1737_vm0, %v1736_v0 }
 0x22e   :  { %v805_v54 = vmul.f32 %v1837_v12, %v797_v50  ;;  %v791_v55 = vsub.f32 2.0, %v783_v51  ;;  %1585 = vmatprep.subr.mxu0 %v1736_v0 }
 0x22f   :  { %v1640_v57 = vpop.eup %1639  ;;  %v806_v58 = vmul.f32 %v1839_v13, %v798_v52  ;;  %v792_v59 = vsub.f32 2.0, %v784_v53 }
 0x230   :  { %v1642_v61 = vpop.eup %1641  ;;  %1432 = vst.msk [vmem:[%s1956_s4 + $0x2] sm:$0x3] %vm699_vm2, %v805_v54  ;;  %v799_v62 = vmul.f32 %v1636_v47, %v791_v55  ;;  %v785_v63 = vmul.f32 %v1640_v57, %v765_v33  ;;  %1573 = vmatmul.mubr.msk.f32.vlgmr.msra.gmra.mxu1 %vm812_vm4, %v805_v54 }
 0x231   :  { %1433 = vst.msk [vmem:[%s1956_s4 + $0x4] sm:$0x3] %vm699_vm2, %v806_v58  ;;  %v800_v1 = vmul.f32 %v1638_v49, %v792_v59  ;;  %v786_v2 = vmul.f32 %v1642_v61, %v768_v34  ;;  %1578 = vmatmul.mubr.msk.f32.vlgmr.msra.gmra.mxu0 %vm812_vm4, %v806_v58  ;;  %1581 = vmatpush3.msk.msra.mxu1 %vm816_vm3, %v77_v56 }
 0x232   :  { %v807_v3 = vmul.f32 %v1845_v16, %v799_v62  ;;  %v793_v4 = vsub.f32 2.0, %v785_v63  ;;  %1582 = vmatprep.mubr.msk.f32.mxu1 %vm1737_vm0, %v1736_v0  ;;  %1586 = vmatpush3.msk.msra.mxu0 %vm816_vm3, %v78_v60 }
 0x233   :  { %v1644_v6 = vpop.eup %1643  ;;  %v808_v7 = vmul.f32 %v1847_v17, %v800_v1  ;;  %v794_v8 = vsub.f32 2.0, %v786_v2  ;;  %1587 = vmatprep.mubr.msk.f32.mxu0 %vm1737_vm0, %v1736_v0  ;;  %1590 = vmatprep.subr.mxu1 %v1736_v0 }
 0x234   :  { %1434 = vst.msk [vmem:[%s1956_s4 + $0x6] sm:$0x3] %vm699_vm2, %v807_v3  ;;  %v801_v10 = vmul.f32 %v1640_v57, %v793_v4  ;;  %v787_v11 = vmul.f32 %v1644_v6, %v771_v37  ;;  %1583 = vmatmul.mubr.msk.f32.vlgmr.msra.gmra.mxu1 %vm812_vm4, %v807_v3  ;;  %1595 = vmatprep.subr.mxu0 %v1736_v0 }
 0x235   :  { %1435 = vst.msk [vmem:[%s1956_s4 + $0x8] sm:$0x3] %vm699_vm2, %v808_v7  ;;  %v802_v12 = vmul.f32 %v1642_v61, %v794_v8  ;;  %1588 = vmatmul.mubr.msk.f32.vlgmr.msra.gmra.mxu0 %vm812_vm4, %v808_v7  ;;  %1591 = vmatpush3.msk.msra.mxu1 %vm816_vm3, %v79_v5 }
 0x236   :  { %v809_v13 = vmul.f32 %v1853_v20, %v801_v10  ;;  %v795_v14 = vsub.f32 2.0, %v787_v11  ;;  %1592 = vmatprep.mubr.msk.f32.mxu1 %vm1737_vm0, %v1736_v0  ;;  %1596 = vmatpush3.msk.msra.mxu0 %vm816_vm3, %v80_v9 }
 0x237   :  { %v810_v16 = vmul.f32 %v1855_v21, %v802_v12  ;;  %1597 = vmatprep.mubr.msk.f32.mxu0 %vm1737_vm0, %v1736_v0  ;;  %1600 = vmatprep.subr.mxu1 %v1736_v0 }
 0x238   :  { %1436 = vst.msk [vmem:[%s1956_s4 + $0xa] sm:$0x3] %vm699_vm2, %v809_v13  ;;  %v803_v17 = vmul.f32 %v1644_v6, %v795_v14  ;;  %1593 = vmatmul.mubr.msk.f32.vlgmr.msra.gmra.mxu1 %vm812_vm4, %v809_v13 }
 0x239   :  { %1437 = vst.msk [vmem:[%s1956_s4 + $0xc] sm:$0x3] %vm699_vm2, %v810_v16  ;;  %1598 = vmatmul.mubr.msk.f32.vlgmr.msra.gmra.mxu0 %vm812_vm4, %v810_v16  ;;  %1601 = vmatpush3.msk.msra.mxu1 %vm816_vm3, %v81_v15 }
 0x23a   :  { %v811_v18 = vmul.f32 %v1861_v24, %v803_v17  ;;  %1602 = vmatprep.mubr.msk.f32.mxu1 %vm1737_vm0, %v1736_v0 }
 0x23c   :  { %1438 = vst.msk [vmem:[%s1956_s4 + $0xe] sm:$0x3] %vm699_vm2, %v811_v18  ;;  %1603 = vmatmul.mubr.msk.f32.vlgmr.msra.gmra.mxu1 %vm812_vm4, %v811_v18  ;;  %s1738_s4 = smov [#allocation8]  }
 0x23d   :  { %s1444_s19 = sshll.u32 %s1738_s4, 4  ;;  %s1445_s19 = int_to_ptr.vmem [resolvable:$true] %s1444_s19 }
 0x23e   :  { %s1705_s22 = scalar_lea.vmem %s1445_s19, 256  ;;  %p1710_p2 = scmp.lt.s32.totalorder %s1445_s19, %s1445_s19 }
 0x23f   :  { %p1706_p1 = scmp.ne.s32.totalorder %s1445_s19, %s1705_s22  ;;  %p1711_p3 = scmp.lt.s32.totalorder %s1705_s22, %s1705_s22 }
 0x241   :  { %p1712_p4 = por %p1711_p3, %p1710_p2 }
 0x243   :  { %p1713_p5 = pnand %p1712_p4, %p1706_p1 }
 0x2ec   :  { %v886_v19 = vpop.f32.mrf.mxu0 }
 0x2ed   :  { %1423 = vst.msk [vmem:[#allocation8] sm:$0x3] %vm1422_vm5, %v886_v19 }
 0x2ee   :  { %v1569_v20 = vpop.f32.mrf.mxu0 }
 0x2f0   :  { %v962_v21 = vpop.f32.mrf.mxu1 }
 0x2f1   :  { %1424 = vst.msk [vmem:[#allocation8 + $0x2] sm:$0x3] %vm1422_vm5, %v962_v21  ;;  %v1038_v22 = vpop.f32.mrf.mxu0 }
 0x2f2   :  { %1425 = vst.msk [vmem:[#allocation8 + $0x4] sm:$0x3] %vm1422_vm5, %v1038_v22  ;;  %v1574_v23 = vpop.f32.mrf.mxu1 }
 0x2f3   :  { %v1579_v0 = vpop.f32.mrf.mxu0 }
 0x2f4   :  { %v1114_v24 = vpop.f32.mrf.mxu1 }
 0x2f5   :  { %1426 = vst.msk [vmem:[#allocation8 + $0x6] sm:$0x3] %vm1422_vm5, %v1114_v24  ;;  %v1190_v25 = vpop.f32.mrf.mxu0 }
 0x2f6   :  { %1427 = vst.msk [vmem:[#allocation8 + $0x8] sm:$0x3] %vm1422_vm5, %v1190_v25  ;;  %v1584_v26 = vpop.f32.mrf.mxu1 }
 0x2f7   :  { %v1589_v27 = vpop.f32.mrf.mxu0 }
 0x2f8   :  { %v1266_v28 = vpop.f32.mrf.mxu1 }
 0x2f9   :  { %1428 = vst.msk [vmem:[#allocation8 + $0xa] sm:$0x3] %vm1422_vm5, %v1266_v28  ;;  %v1342_v29 = vpop.f32.mrf.mxu0 }
 0x2fa   :  { %1429 = vst.msk [vmem:[#allocation8 + $0xc] sm:$0x3] %vm1422_vm5, %v1342_v29  ;;  %v1594_v30 = vpop.f32.mrf.mxu1 }
 0x2fb   :  { %v1599_v31 = vpop.f32.mrf.mxu0 }
 0x2fc   :  { %v1418_v32 = vpop.f32.mrf.mxu1 }
 0x2fd   :  { %1430 = vst.msk [vmem:[#allocation8 + $0xe] sm:$0x3] %vm1422_vm5, %v1418_v32 }
 0x2fe   :  { %v1604_v33 = vpop.f32.mrf.mxu1 }
 0x2ff   :  { %1716 = shalt.err (!%p1713_p5)
}
 0x300   :  { %1450 = dma.vmem_to_hbm [thread:$0]  %s1445_s19, 256, %s1955_s3, [#allocation4], %s1733_s20, %s1733_s20, %s1734_s21  }
 0x301   :  { %1729 = dma.done.wait [#allocation4], 256  }
 0x302   :  { %1730 = vsyncadd [#allocation4], 4294967040 }
 0x303   :  { %1458 = vsyncpa [#allocation3], 1 }
 0x304   :  { %1459 = vsyncpa [#allocation6], 1 }
 0x305   :  { %1460 = vsyncpa [#allocation4], 1 }

</bundles_post_ra>
